<compile_context>
chip_gen: v6e
topology: v6e:2x2x1
jax: 0.10.0
libtpu: 0.0.40
codegen_flags: <defaults>
</compile_context>

<pallas_src>
import math
import functools

import jax
import jax.numpy as jnp
from jax.experimental import pallas as pl
from jax.experimental.pallas import tpu as pltpu


def _round_up(x, m):
    return (x + m - 1) // m * m


# ----------------------------- fused Pallas kernel ---------------------------

def _sinekan_fused_kernel(*refs, num_layers, acts_dtype):
    """All SineKAN layers for one row tile; intermediates stay in VMEM/vregs.

    refs = (x_ref, [w_0, phase_0, amp_0, bias_0, w_1, ...], o_ref)
      x_ref:   (tile_n, in_0)                acts_dtype
      w_l:     (in_l, grid * in_l)           acts_dtype  (freq-replication matrix)
      phase_l: (1, grid * in_l)              f32         (lane-dense, g-major)
      amp_l:   (grid * in_l, out_l)          acts_dtype
      bias_l:  (1, out_l)                    f32
      o_ref:   (tile_n, out_last)            f32
    """
    x_ref = refs[0]
    o_ref = refs[-1]

    h = x_ref[...].astype(acts_dtype)                        # (tn, in_0)
    for l in range(num_layers):
        w_ref, p_ref, a_ref, b_ref = refs[1 + 4 * l: 5 + 4 * l]
        # arg[n, g*in+k] = h[n,k]*freq[g] + phase[k,g]
        # replication + freq scaling ride the idle MXU; f32 accumulate.
        arg = jnp.dot(h, w_ref[...],
                      preferred_element_type=jnp.float32) + p_ref[...]
        # sin runs in acts_dtype (packed bf16 VALU on v6e/v7x, f32 on v5e).
        s = jnp.sin(arg.astype(acts_dtype))                  # (tn, g*in_l)
        y = jnp.dot(s, a_ref[...],
                    preferred_element_type=jnp.float32) + b_ref[...]
        if l == num_layers - 1:
            o_ref[...] = y                                   # f32 output
        else:
            h = y.astype(acts_dtype)


def sinekan_forward(kparams, x, *, grid_size, max_tile_rows=2048):
    """Fused SineKAN forward: x (..., in_0) -> (..., out_last)."""
    del grid_size  # layout already folded into the per-layer matrices
    num_layers = len(kparams)
    in0 = kparams[0]["in_dim"]
    out_last = kparams[-1]["out_dim"]
    acts_dtype = kparams[0]["amp2d"].dtype
    lead = x.shape[:-1]

    x2d = x.reshape(-1, in0).astype(acts_dtype)
    n = x2d.shape[0]

    # sublane quantum: 8 for f32, 16 for bf16 (packed sublanes)
    sub = max(8, 32 // jnp.dtype(acts_dtype).itemsize)
    max_tile = max(sub, (int(max_tile_rows) // sub) * sub)   # defensive rounding
    n_ru = _round_up(max(n, 1), sub)
    if n_ru <= 2 * max_tile:
        # aim for >= 2 grid steps so both v7x TensorCores get work
        tile_n = min(max_tile, max(sub, _round_up((n_ru + 1) // 2, sub)))
    else:
        tile_n = max_tile
    n_pad = _round_up(n_ru, tile_n)
    if n_pad != n:                      # remainder handling: pad, slice back
        x2d = jnp.pad(x2d, ((0, n_pad - n), (0, 0)))

    flat_inputs = [x2d]
    in_specs = [pl.BlockSpec((tile_n, in0), lambda i: (i, 0))]
    for p in kparams:
        k_l = p["w"].shape[1]
        in_l, out_l = p["in_dim"], p["out_dim"]
        flat_inputs += [p["w"], p["phase_row"], p["amp2d"], p["bias"]]
        # constant block index -> params stay resident in VMEM across steps
        in_specs += [
            pl.BlockSpec((in_l, k_l), lambda i: (0, 0)),
            pl.BlockSpec((1, k_l), lambda i: (0, 0)),
            pl.BlockSpec((k_l, out_l), lambda i: (0, 0)),
            pl.BlockSpec((1, out_l), lambda i: (0, 0)),
        ]

    kernel = functools.partial(_sinekan_fused_kernel,
                               num_layers=num_layers, acts_dtype=acts_dtype)
    out = pl.pallas_call(
        kernel,
        out_shape=jax.ShapeDtypeStruct((n_pad, out_last), jnp.float32),
        grid=(n_pad // tile_n,),
        in_specs=in_specs,
        out_specs=pl.BlockSpec((tile_n, out_last), lambda i: (i, 0)),
        compiler_params=pltpu.CompilerParams(
            dimension_semantics=("parallel",)),
    )(*flat_inputs)

    return out[:n].reshape(lead + (out_last,))


# ------------------------- parameter init (plain JAX) -----------------------

def init_sinekan_params(key, layers_hidden, grid_size=8):
    """Deterministic synthetic init mirroring SineKANLayer.__init__ shapes."""
    params = []
    for i, (in_dim, out_dim) in enumerate(zip(layers_hidden[:-1],
                                              layers_hidden[1:])):
        is_first = (i == 0)
        key, k_amp, k_gp, k_ip = jax.random.split(key, 4)

        grid_norm = (jnp.arange(grid_size, dtype=jnp.float32) + 1.0
                     ).reshape(1, 1, grid_size)
        if is_first:
            amp = (jax.random.normal(k_amp, (out_dim, in_dim, 1),
                                     dtype=jnp.float32) * 0.4
                   / out_dim / grid_norm)
        else:
            amp = (jax.random.uniform(k_amp, (out_dim, in_dim, 1),
                                      minval=-1.0, maxval=1.0,
                                      dtype=jnp.float32)
                   / out_dim / grid_norm)                    # (out, in, grid)

        grid_phase = jnp.linspace(0.0, math.pi, grid_size).reshape(1, grid_size)
        input_phase = jnp.linspace(0.0, math.pi, in_dim).reshape(in_dim, 1)
        gpp = jax.random.uniform(k_gp, (1, grid_size)) / grid_size * 0.1
        ipp = jax.random.uniform(k_ip, (in_dim, 1)) / in_dim * 0.1
        phase = grid_phase + input_phase + gpp + ipp         # (in, grid)

        freq = (jnp.arange(1, grid_size + 1, dtype=jnp.float32)
                / (grid_size + 1) ** (1 - int(is_first)))    # (grid,)

        bias = jnp.ones((1, out_dim), jnp.float32) / out_dim

        params.append(dict(freq=freq, phase=phase, amp=amp.astype(jnp.float32),
                           bias=bias, in_dim=in_dim, out_dim=out_dim))
    return params


def prepare_kernel_params(params, grid_size, acts_dtype=jnp.float32):
    """One-time relayout to the lane-dense, g-major kernel format.

    acts_dtype=jnp.bfloat16 is recommended on v6e / v7x (bf16 VALU path for the
    dominant sin polynomial); keep float32 on v5e (no bf16 VALU/EUP).
    """
    kparams = []
    for p in params:
        in_dim, out_dim = p["in_dim"], p["out_dim"]
        # w[k, g*in + k'] = freq[g] * (k == k')  -> h @ w == lane-tiled h * freq
        eye = jnp.eye(in_dim, dtype=jnp.float32)
        w = (p["freq"][None, :, None] * eye[:, None, :]).reshape(
            in_dim, grid_size * in_dim)
        # phase_row[0, g*in + k] = phase[k, g]
        phase_row = jnp.transpose(p["phase"]).reshape(1, -1)
        # amp2d[g*in + k, o] = amp[o, k, g]
        amp2d = jnp.transpose(p["amp"], (2, 1, 0)).reshape(
            grid_size * in_dim, out_dim)
        kparams.append(dict(
            w=w.astype(acts_dtype),
            phase_row=phase_row.astype(jnp.float32),
            amp2d=amp2d.astype(acts_dtype),
            bias=p["bias"].astype(jnp.float32),
            in_dim=in_dim, out_dim=out_dim))
    return kparams


def recommended_acts_dtype():
    """bf16 vector math on chips with a bf16 VALU (v6e/v7x); f32 otherwise."""
    try:
        kind = jax.devices()[0].device_kind.lower()
    except Exception:
        return jnp.float32
    return jnp.bfloat16 if ("v6" in kind or "v7" in kind) else jnp.float32


# ---------------------- pure-JAX reference (torch einsum) --------------------

def sinekan_reference(params, x, *, grid_size):
    lead = x.shape[:-1]
    h = x.astype(jnp.float32)
    for p in params:
        h2d = h.reshape(-1, p["in_dim"])                             # (N, in)
        s = jnp.sin(h2d[:, :, None] * p["freq"][None, None, :]
                    + p["phase"][None, :, :])                        # (N, in, g)
        h = jnp.einsum("nkg,okg->no", s, p["amp"],
                       precision=jax.lax.Precision.HIGHEST) + p["bias"]
    return h.reshape(lead + (params[-1]["out_dim"],))


# ---------------------------------- main ------------------------------------

if __name__ == "__main__":
    grid_size = 8
    layers_hidden = [16, 32, 8]          # SineKAN([16, 32, 8], grid_size=8)

    key = jax.random.PRNGKey(0)
    key, kx1, kx2 = jax.random.split(key, 3)
    params = init_sinekan_params(key, layers_hidden, grid_size=grid_size)

    # f32 vector-math path (recommended on v5e; exact-precision baseline)
    kparams_f32 = prepare_kernel_params(params, grid_size,
                                        acts_dtype=jnp.float32)

    # small, tile-aligned input: (2, 4, 16) -> 8 flattened rows
    x1 = jax.random.normal(kx1, (2, 4, layers_hidden[0]), dtype=jnp.float32)
    out1 = jax.block_until_ready(sinekan_forward(kparams_f32, x1,
                                                 grid_size=grid_size))
    ref1 = sinekan_reference(params, x1, grid_size=grid_size)
    assert out1.shape == (2, 4, layers_hidden[-1]), out1.shape
    # tolerance covers XLA-vs-Mosaic default matmul precision differences
    assert jnp.allclose(out1, ref1, rtol=1e-2, atol=1e-2), (
        float(jnp.max(jnp.abs(out1 - ref1))))

    # non-divisible row count (3*37 = 111 rows): padded remainder + 2-step grid
    x2 = jax.random.normal(kx2, (3, 37, layers_hidden[0]), dtype=jnp.float32)
    out2 = jax.block_until_ready(sinekan_forward(kparams_f32, x2,
                                                 grid_size=grid_size))
    ref2 = sinekan_reference(params, x2, grid_size=grid_size)
    assert out2.shape == (3, 37, layers_hidden[-1]), out2.shape
    assert jnp.allclose(out2, ref2, rtol=1e-2, atol=1e-2), (
        float(jnp.max(jnp.abs(out2 - ref2))))

    # bf16 vector-math path (recommended on v6e / v7x); f32 accumulation
    kparams_bf16 = prepare_kernel_params(params, grid_size,
                                         acts_dtype=jnp.bfloat16)
    out3 = jax.block_until_ready(sinekan_forward(kparams_bf16, x1,
                                                 grid_size=grid_size))
    assert out3.shape == (2, 4, layers_hidden[-1]), out3.shape
    assert jnp.allclose(out3, ref1, rtol=8e-2, atol=8e-2), (
        float(jnp.max(jnp.abs(out3 - ref1))))

    print("KERNEL_OK")
</pallas_src>

<mosaic_0001>
module attributes {stable_mosaic.version = 11 : i64} {
  func.func @_sinekan_fused_kernel(%arg0: i32, %arg1: memref<8x16xf32, #tpu.memory_space<vmem>>, %arg2: memref<16x128xf32, #tpu.memory_space<vmem>>, %arg3: memref<1x128xf32, #tpu.memory_space<vmem>>, %arg4: memref<128x32xf32, #tpu.memory_space<vmem>>, %arg5: memref<1x32xf32, #tpu.memory_space<vmem>>, %arg6: memref<32x256xf32, #tpu.memory_space<vmem>>, %arg7: memref<1x256xf32, #tpu.memory_space<vmem>>, %arg8: memref<256x8xf32, #tpu.memory_space<vmem>>, %arg9: memref<1x8xf32, #tpu.memory_space<vmem>>, %arg10: memref<8x8xf32, #tpu.memory_space<vmem>>) attributes {dimension_semantics = [#tpu.dimension_semantics<parallel>], iteration_bounds = array<i64: 1>, scalar_prefetch = 0 : i64, scratch_operands = 0 : i64, tpu.core_type = #tpu.core_type<tc>, window_params = [{transform_indices = @transform_0, window_bounds = array<i64: 8, 16>}, {pipeline_mode = #tpu.pipeline_mode<synchronous>, transform_indices = @transform_1, window_bounds = array<i64: 16, 128>}, {pipeline_mode = #tpu.pipeline_mode<synchronous>, transform_indices = @transform_2, window_bounds = array<i64: 1, 128>}, {pipeline_mode = #tpu.pipeline_mode<synchronous>, transform_indices = @transform_3, window_bounds = array<i64: 128, 32>}, {pipeline_mode = #tpu.pipeline_mode<synchronous>, transform_indices = @transform_4, window_bounds = array<i64: 1, 32>}, {pipeline_mode = #tpu.pipeline_mode<synchronous>, transform_indices = @transform_5, window_bounds = array<i64: 32, 256>}, {pipeline_mode = #tpu.pipeline_mode<synchronous>, transform_indices = @transform_6, window_bounds = array<i64: 1, 256>}, {pipeline_mode = #tpu.pipeline_mode<synchronous>, transform_indices = @transform_7, window_bounds = array<i64: 256, 8>}, {pipeline_mode = #tpu.pipeline_mode<synchronous>, transform_indices = @transform_8, window_bounds = array<i64: 1, 8>}, {transform_indices = @transform_9, window_bounds = array<i64: 8, 8>}]} {
    %c0 = arith.constant 0 : index
    %c0_0 = arith.constant 0 : index
    %0 = vector.load %arg1[%c0, %c0_0] : memref<8x16xf32, #tpu.memory_space<vmem>>, vector<8x16xf32>
    %c0_1 = arith.constant 0 : index
    %c0_2 = arith.constant 0 : index
    %1 = vector.load %arg2[%c0_1, %c0_2] : memref<16x128xf32, #tpu.memory_space<vmem>>, vector<16x128xf32>
    %cst = arith.constant dense<0.000000e+00> : vector<8x128xf32>
    %2 = tpu.matmul %0, %1, %cst {dimension_numbers = #tpu.dot_dimension_numbers<[1], [0], [0], [1], [0, 0, 1, 1], [], []>} : vector<8x16xf32>, vector<16x128xf32>, vector<8x128xf32> -> vector<8x128xf32>
    %c0_3 = arith.constant 0 : index
    %c0_4 = arith.constant 0 : index
    %3 = vector.load %arg3[%c0_3, %c0_4] : memref<1x128xf32, #tpu.memory_space<vmem>>, vector<1x128xf32>
    %4 = vector.broadcast %3 : vector<1x128xf32> to vector<8x128xf32>
    %5 = arith.addf %2, %4 : vector<8x128xf32>
    %6 = math.sin %5 : vector<8x128xf32>
    %c0_5 = arith.constant 0 : index
    %c0_6 = arith.constant 0 : index
    %7 = vector.load %arg4[%c0_5, %c0_6] : memref<128x32xf32, #tpu.memory_space<vmem>>, vector<128x32xf32>
    %cst_7 = arith.constant dense<0.000000e+00> : vector<8x32xf32>
    %8 = tpu.matmul %6, %7, %cst_7 {dimension_numbers = #tpu.dot_dimension_numbers<[1], [0], [0], [1], [0, 0, 1, 1], [], []>} : vector<8x128xf32>, vector<128x32xf32>, vector<8x32xf32> -> vector<8x32xf32>
    %c0_8 = arith.constant 0 : index
    %c0_9 = arith.constant 0 : index
    %9 = vector.load %arg5[%c0_8, %c0_9] : memref<1x32xf32, #tpu.memory_space<vmem>>, vector<1x32xf32>
    %10 = vector.broadcast %9 : vector<1x32xf32> to vector<8x32xf32>
    %11 = arith.addf %8, %10 : vector<8x32xf32>
    %c0_10 = arith.constant 0 : index
    %c0_11 = arith.constant 0 : index
    %12 = vector.load %arg6[%c0_10, %c0_11] : memref<32x256xf32, #tpu.memory_space<vmem>>, vector<32x256xf32>
    %cst_12 = arith.constant dense<0.000000e+00> : vector<8x256xf32>
    %13 = tpu.matmul %11, %12, %cst_12 {dimension_numbers = #tpu.dot_dimension_numbers<[1], [0], [0], [1], [0, 0, 1, 1], [], []>} : vector<8x32xf32>, vector<32x256xf32>, vector<8x256xf32> -> vector<8x256xf32>
    %c0_13 = arith.constant 0 : index
    %c0_14 = arith.constant 0 : index
    %14 = vector.load %arg7[%c0_13, %c0_14] : memref<1x256xf32, #tpu.memory_space<vmem>>, vector<1x256xf32>
    %15 = vector.broadcast %14 : vector<1x256xf32> to vector<8x256xf32>
    %16 = arith.addf %13, %15 : vector<8x256xf32>
    %17 = math.sin %16 : vector<8x256xf32>
    %c0_15 = arith.constant 0 : index
    %c0_16 = arith.constant 0 : index
    %18 = vector.load %arg8[%c0_15, %c0_16] : memref<256x8xf32, #tpu.memory_space<vmem>>, vector<256x8xf32>
    %cst_17 = arith.constant dense<0.000000e+00> : vector<8x8xf32>
    %19 = tpu.matmul %17, %18, %cst_17 {dimension_numbers = #tpu.dot_dimension_numbers<[1], [0], [0], [1], [0, 0, 1, 1], [], []>} : vector<8x256xf32>, vector<256x8xf32>, vector<8x8xf32> -> vector<8x8xf32>
    %c0_18 = arith.constant 0 : index
    %c0_19 = arith.constant 0 : index
    %20 = vector.load %arg9[%c0_18, %c0_19] : memref<1x8xf32, #tpu.memory_space<vmem>>, vector<1x8xf32>
    %21 = vector.broadcast %20 : vector<1x8xf32> to vector<8x8xf32>
    %22 = arith.addf %19, %21 : vector<8x8xf32>
    %c0_20 = arith.constant 0 : index
    %c0_21 = arith.constant 0 : index
    %23 = vector.load %arg10[%c0_20, %c0_21] : memref<8x8xf32, #tpu.memory_space<vmem>>, vector<8x8xf32>
    tpu.vector_store %arg10[%c0_20, %c0_21], %22 {strides = array<i32>} : memref<8x8xf32, #tpu.memory_space<vmem>>, vector<8x8xf32>,
    return
  }
  func.func @transform_0(%arg0: i32) -> (i32, i32) {
    %c0_i32 = arith.constant 0 : i32
    %c0_i32_0 = arith.constant 0 : i32
    return %arg0, %c0_i32 : i32, i32
  }
  func.func @transform_1(%arg0: i32) -> (i32, i32) {
    %c0_i32 = arith.constant 0 : i32
    %c0_i32_0 = arith.constant 0 : i32
    %c0_i32_1 = arith.constant 0 : i32
    return %c0_i32, %c0_i32_0 : i32, i32
  }
  func.func @transform_2(%arg0: i32) -> (i32, i32) {
    %c0_i32 = arith.constant 0 : i32
    %c0_i32_0 = arith.constant 0 : i32
    %c0_i32_1 = arith.constant 0 : i32
    return %c0_i32, %c0_i32_0 : i32, i32
  }
  func.func @transform_3(%arg0: i32) -> (i32, i32) {
    %c0_i32 = arith.constant 0 : i32
    %c0_i32_0 = arith.constant 0 : i32
    %c0_i32_1 = arith.constant 0 : i32
    return %c0_i32, %c0_i32_0 : i32, i32
  }
  func.func @transform_4(%arg0: i32) -> (i32, i32) {
    %c0_i32 = arith.constant 0 : i32
    %c0_i32_0 = arith.constant 0 : i32
    %c0_i32_1 = arith.constant 0 : i32
    return %c0_i32, %c0_i32_0 : i32, i32
  }
  func.func @transform_5(%arg0: i32) -> (i32, i32) {
    %c0_i32 = arith.constant 0 : i32
    %c0_i32_0 = arith.constant 0 : i32
    %c0_i32_1 = arith.constant 0 : i32
    return %c0_i32, %c0_i32_0 : i32, i32
  }
  func.func @transform_6(%arg0: i32) -> (i32, i32) {
    %c0_i32 = arith.constant 0 : i32
    %c0_i32_0 = arith.constant 0 : i32
    %c0_i32_1 = arith.constant 0 : i32
    return %c0_i32, %c0_i32_0 : i32, i32
  }
  func.func @transform_7(%arg0: i32) -> (i32, i32) {
    %c0_i32 = arith.constant 0 : i32
    %c0_i32_0 = arith.constant 0 : i32
    %c0_i32_1 = arith.constant 0 : i32
    return %c0_i32, %c0_i32_0 : i32, i32
  }
  func.func @transform_8(%arg0: i32) -> (i32, i32) {
    %c0_i32 = arith.constant 0 : i32
    %c0_i32_0 = arith.constant 0 : i32
    %c0_i32_1 = arith.constant 0 : i32
    return %c0_i32, %c0_i32_0 : i32, i32
  }
  func.func @transform_9(%arg0: i32) -> (i32, i32) {
    %c0_i32 = arith.constant 0 : i32
    %c0_i32_0 = arith.constant 0 : i32
    return %arg0, %c0_i32 : i32, i32
  }
}

</mosaic_0001>

<bundles_post_ra>
// kernel: tpu_custom_call.1
= control target key start
LH: loop header
LB: loop body
LE: loop exit
PB: predicated region body
PF: predicated region fallthrough
CT: control target
= control target key end

     0   :  { %v911_v1 = vmov 0.0   ;;  %vm912_vm0 = vmmov 0   ;;  %s1290_s0 = inlined_call_operand.vmem [shape: f32[8,16], index: 0, kind: input, shape index: {}]   ;;  %s1291_s1 = inlined_call_operand.vmem [shape: f32[16,128], index: 1, kind: input, shape index: {}]   ;;  %s1292_s2 = inlined_call_operand.vmem [shape: f32[1,128], index: 2, kind: input, shape index: {}]   ;;  %s1293_s3 = inlined_call_operand.vmem [shape: f32[128,32], index: 3, kind: input, shape index: {}]   ;;  %s1294_s4 = inlined_call_operand.vmem [shape: f32[1,32], index: 4, kind: input, shape index: {}]   ;;  %s1295_s5 = inlined_call_operand.vmem [shape: f32[32,256], index: 5, kind: input, shape index: {}]   ;;  %s1296_s6 = inlined_call_operand.vmem [shape: f32[1,256], index: 6, kind: input, shape index: {}]   ;;  %s1297_s7 = inlined_call_operand.vmem [shape: f32[256,8], index: 7, kind: input, shape index: {}]   ;;  %s1298_s8 = inlined_call_operand.vmem [shape: f32[1,8], index: 8, kind: input, shape index: {}]   ;;  %s1299_s9 = inlined_call_operand.hbm [shape: f32[8,8], index: 9, kind: output, shape index: {}]  }
   0x1   :  { %v35_v0 = vld [vmem:[%s1291_s1 + $0x8] sm:$0xff]  ;;  %814 = vmatprep.subr.mxu1 %v911_v1  ;;  %v34_v2 = vld [vmem:[%s1291_s1] sm:$0xff]  ;;  %818 = vmatprep.mubr.msk.f32.mxu1 %vm912_vm0, %v911_v1 }
   0x2   :  { %14 = vsyncpa [#allocation3], 0  ;;  %815 = vmatpush3.msra.mxu1 %v35_v0  ;;  %v33_v3 = vld [vmem:[%s1290_s0] sm:$0xff]  ;;  %vm43_vm1 = vcmask 130048   ;;  %402 = vmatprep.mubr.f32.mxu0 %v911_v1  ;;  %v236_v4 = vld [vmem:[%s1293_s3 + $0x78] sm:$0xff]  ;;  %vm334_vm15 = vcmask 261120  }
   0x3   :  { %816 = vmatprep.subr.mxu1 %v911_v1  ;;  %v235_v5 = vld [vmem:[%s1293_s3 + $0x70] sm:$0xff]  ;;  %v234_v6 = vld [vmem:[%s1293_s3 + $0x68] sm:$0xff]  ;;  %v233_v7 = vld [vmem:[%s1293_s3 + $0x60] sm:$0xff]  ;;  %v913_v39 = vmov 683565275   ;;  %s919_s27 = smov [#allocation2]  }
   0x4   :  { %817 = vmatpush3.msra.mxu1 %v34_v2  ;;  %v232_v8 = vld [vmem:[%s1293_s3 + $0x58] sm:$0xff]  ;;  %v231_v9 = vld [vmem:[%s1293_s3 + $0x50] sm:$0xff]  ;;  %v230_v10 = vld [vmem:[%s1293_s3 + $0x48] sm:$0xff]  ;;  %v914_v41 = vmov 2475754826   ;;  %s734_s28 = sshll.u32 %s919_s27, 4  ;;  %s735_s28 = int_to_ptr.vmem [resolvable:$true] %s734_s28 }
   0x5   :  { %819 = vmatmul.mubr.msk.f32.vlgmr.msra.gmra.mxu1 %vm43_vm1, %v33_v3  ;;  %821 = vmatprep.subr.mxu1 %v911_v1  ;;  %v229_v11 = vld [vmem:[%s1293_s3 + $0x40] sm:$0xff]  ;;  %v228_v12 = vld [vmem:[%s1293_s3 + $0x38] sm:$0xff]  ;;  %v227_v13 = vld [vmem:[%s1293_s3 + $0x30] sm:$0xff]  ;;  %v915_v44 = vmov 2131351028   ;;  %s889_s29 = scalar_lea.vmem %s735_s28, 128  ;;  %p894_p1 = scmp.lt.s32.totalorder %s735_s28, %s735_s28 }
   0x6   :  { %853 = vmatprep.mubr.msk.f32.mxu1 %vm912_vm0, %v911_v1  ;;  %822 = vmatpush3.msra.mxu1 %v236_v4  ;;  %v226_v14 = vld [vmem:[%s1293_s3 + $0x28] sm:$0xff]  ;;  %v225_v15 = vld [vmem:[%s1293_s3 + $0x20] sm:$0xff]  ;;  %v224_v16 = vld [vmem:[%s1293_s3 + $0x18] sm:$0xff]  ;;  %v916_v47 = vmov 2102212464   ;;  %p890_p0 = scmp.ne.s32.totalorder %s735_s28, %s889_s29  ;;  %p895_p2 = scmp.lt.s32.totalorder %s889_s29, %s889_s29 }
   0x7   :  { %823 = vmatprep.subr.mxu1 %v911_v1  ;;  %v223_v17 = vld [vmem:[%s1293_s3 + $0x10] sm:$0xff]  ;;  %v222_v18 = vld [vmem:[%s1293_s3 + $0x8] sm:$0xff]  ;;  %v221_v19 = vld [vmem:[%s1293_s3] sm:$0xff]  ;;  %v917_v50 = vmov 920167782  }
   0x8   :  { %824 = vmatpush3.msra.mxu1 %v235_v5  ;;  %v321_v20 = vld [vmem:[%s1295_s5 + $0x38] sm:$0xff]  ;;  %v320_v21 = vld [vmem:[%s1295_s5 + $0x30] sm:$0xff]  ;;  %v319_v22 = vld [vmem:[%s1295_s5 + $0x28] sm:$0xff]  ;;  %v918_v53 = vmov 1326507024   ;;  %p896_p3 = por %p895_p2, %p894_p1 }
   0x9   :  { %825 = vmatprep.subr.mxu1 %v911_v1  ;;  %362 = vmatprep.subr.mxu0 %v321_v20  ;;  %v318_v23 = vld [vmem:[%s1295_s5 + $0x20] sm:$0xff]  ;;  %v317_v24 = vld [vmem:[%s1295_s5 + $0x18] sm:$0xff] }
   0xa   :  { %826 = vmatpush3.msra.mxu1 %v234_v6  ;;  %363 = vmatpush1.msra.mxu0 %v320_v21  ;;  %v742_v25 = vld [vmem:[%s1292_s2] ss:$0 sm:$0xff]  ;;  %p897_p4 = pnand %p896_p3, %p890_p0 }
   0xb   :  { %827 = vmatprep.subr.mxu1 %v911_v1  ;;  %364 = vmatprep.subr.mxu0 %v319_v22 }
   0xc   :  { %828 = vmatpush3.msra.mxu1 %v233_v7  ;;  %365 = vmatpush1.msra.mxu0 %v318_v23 }
   0xd   :  { %829 = vmatprep.subr.mxu1 %v911_v1  ;;  %366 = vmatprep.subr.mxu0 %v317_v24 }
   0xe   :  { %830 = vmatpush3.msra.mxu1 %v232_v8 }
   0xf   :  { %831 = vmatprep.subr.mxu1 %v911_v1 }
  0x10   :  { %832 = vmatpush3.msra.mxu1 %v231_v9 }
  0x11   :  { %833 = vmatprep.subr.mxu1 %v911_v1 }
  0x12   :  { %834 = vmatpush3.msra.mxu1 %v230_v10 }
  0x13   :  { %835 = vmatprep.subr.mxu1 %v911_v1 }
  0x14   :  { %836 = vmatpush3.msra.mxu1 %v229_v11 }
  0x15   :  { %837 = vmatprep.subr.mxu1 %v911_v1 }
  0x16   :  { %838 = vmatpush3.msra.mxu1 %v228_v12 }
  0x17   :  { %839 = vmatprep.subr.mxu1 %v911_v1 }
  0x18   :  { %840 = vmatpush3.msra.mxu1 %v227_v13 }
  0x19   :  { %841 = vmatprep.subr.mxu1 %v911_v1 }
  0x1a   :  { %842 = vmatpush3.msra.mxu1 %v226_v14 }
  0x1b   :  { %843 = vmatprep.subr.mxu1 %v911_v1 }
  0x1c   :  { %844 = vmatpush3.msra.mxu1 %v225_v15 }
  0x1d   :  { %845 = vmatprep.subr.mxu1 %v911_v1 }
  0x1e   :  { %846 = vmatpush3.msra.mxu1 %v224_v16 }
  0x1f   :  { %847 = vmatprep.subr.mxu1 %v911_v1 }
  0x20   :  { %848 = vmatpush3.msra.mxu1 %v223_v17 }
  0x21   :  { %849 = vmatprep.subr.mxu1 %v911_v1 }
  0x22   :  { %850 = vmatpush3.msra.mxu1 %v222_v18 }
  0x23   :  { %851 = vmatprep.subr.mxu1 %v911_v1 }
  0x24   :  { %852 = vmatpush3.msra.mxu1 %v221_v19 }
  0xc5   :  { %v113_v26 = vpop.f32.mrf.mxu1 }
  0xc6   :  { %v1045_v27 = vadd.f32 %v742_v25, %v113_v26 }
  0xc7   :  { %v820_v28 = vpop.f32.mrf.mxu1 }
  0xc8   :  { %v120_v29 = vand.u32 2139095040, %v1045_v27  ;;  %v117_v33 = vand.u32 2147483647, %v1045_v27  ;;  %vm119_vm9 = vcmp.lt.s32.totalorder %v1045_v27, 0  ;;  %vm209_vm14 = vweird.f32 %v1045_v27 }
  0xca   :  { %v121_v30 = vshrl.u32 %v120_v29, 23  ;;  %v124_v36 = vand.u32 8388607, %v117_v33  ;;  %vm118_vm10 = vcmp.le.f32.partialorder %v117_v33, 0.7853982 }
  0xcc   :  { %v744_v31 = vadd.s32 4294967169, %v121_v30  ;;  %v125_v55 = vor.u32 8388608, %v124_v36 }
  0xce   :  { %v127_v32 = vadd.s32 1, %v744_v31  ;;  %v165_v5 = vshll.u32 %v125_v55, 8 }
  0xd0   :  { %vm128_vm2 = vcmp.gt.s32.totalorder %v127_v32, 0 }
  0xd1   :  { %v129_v34 = vsel %vm128_vm2, %v127_v32, 0 }
  0xd2   :  { %v131_v35 = vand.u32 31, %v129_v34  ;;  %v130_v38 = vshrl.u32 %v129_v34, 5 }
  0xd4   :  { %v132_v37 = vsub.s32 32, %v131_v35  ;;  %v134_v40 = vshll.u32 %v913_v39, %v131_v35  ;;  %v137_v42 = vshll.u32 %v914_v41, %v131_v35  ;;  %v140_v46 = vshll.u32 %v915_v44, %v131_v35 }
  0xd5   :  { %v143_v49 = vshll.u32 %v916_v47, %v131_v35  ;;  %v146_v52 = vshll.u32 %v917_v50, %v131_v35  ;;  %vm149_vm3 = vcmp.lt.s32.totalorder %v130_v38, 1  ;;  %vm152_vm4 = vcmp.lt.s32.totalorder %v130_v38, 4 }
  0xd6   :  { %v135_v43 = vshrl.u32 %v914_v41, %v132_v37  ;;  %v138_v45 = vshrl.u32 %v915_v44, %v132_v37  ;;  %v141_v48 = vshrl.u32 %v916_v47, %v132_v37  ;;  %v144_v51 = vshrl.u32 %v917_v50, %v132_v37 }
  0xd7   :  { %v147_v54 = vshrl.u32 %v918_v53, %v132_v37  ;;  %v133_v0 = vshrl.u32 %v913_v39, %v132_v37  ;;  %vm151_vm5 = vcmp.lt.s32.totalorder %v130_v38, 3  ;;  %vm150_vm6 = vcmp.lt.s32.totalorder %v130_v38, 2 }
  0xd8   :  { %v136_v56 = vor.u32 %v135_v43, %v134_v40  ;;  %v139_v57 = vor.u32 %v138_v45, %v137_v42  ;;  %v142_v58 = vor.u32 %v141_v48, %v140_v46  ;;  %v145_v59 = vor.u32 %v144_v51, %v143_v49 }
  0xd9   :  { %v148_v60 = vor.u32 %v147_v54, %v146_v52 }
  0xda   :  { %v154_v61 = vsel %vm152_vm4, %v142_v58, 2102212464  ;;  %v157_v62 = vsel %vm149_vm3, %v136_v56, %v139_v57  ;;  %v161_v63 = vsel %vm149_vm3, %v139_v57, %v142_v58  ;;  %v158_v1 = vsel %vm152_vm4, %v145_v59, 920167782 }
  0xdb   :  { %v162_v2 = vsel %vm152_vm4, %v148_v60, 1326507024  ;;  %v159_v3 = vsel %vm151_vm5, %v142_v58, %v158_v1  ;;  %v153_v6 = vsel %vm149_vm3, %v133_v0, %v136_v56  ;;  %v155_v7 = vsel %vm151_vm5, %v139_v57, %v154_v61  ;;  %v315_v0 = vld [vmem:[%s1295_s5 + $0x8] sm:$0xff]  ;;  %v314_v1 = vld [vmem:[%s1295_s5] sm:$0xff] }
  0xdc   :  { %v163_v4 = vsel %vm151_vm5, %v145_v59, %v162_v2  ;;  %v160_v8 = vsel %vm150_vm6, %v157_v62, %v159_v3  ;;  %v156_v14 = vsel %vm150_vm6, %v153_v6, %v155_v7  ;;  %v632_v6 = vld [vmem:[%s1297_s7 + $0x78] sm:$0xff]  ;;  %v647_v7 = vld [vmem:[%s1297_s7 + $0xf0] sm:$0xff] }
  0xdd   :  { %v164_v9 = vsel %vm150_vm6, %v161_v63, %v163_v4  ;;  %v1065_v12 = vmul.u32.u64.low %v165_v5, %v160_v8  ;;  %v1066_v13 = vmul.u32.u64.high %v165_v5, %v160_v8, %v1065_v12  ;;  %v172_v16 = vmul.u32 %v165_v5, %v156_v14  ;;  %v316_v63 = vld [vmem:[%s1295_s5 + $0x10] sm:$0xff]  ;;  %v628_v14 = vld [vmem:[%s1297_s7 + $0x58] sm:$0xff] }
  0xde   :  { %v1062_v10 = vmul.u32.u64.low %v165_v5, %v164_v9  ;;  %v1063_v11 = vmul.u32.u64.high %v165_v5, %v164_v9, %v1062_v10  ;;  %367 = vmatpush1.msra.mxu0 %v316_v63  ;;  %v648_v5 = vld [vmem:[%s1297_s7 + $0xf8] sm:$0xff]  ;;  %v631_v8 = vld [vmem:[%s1297_s7 + $0x70] sm:$0xff]  ;;  %v646_v9 = vld [vmem:[%s1297_s7 + $0xe8] sm:$0xff] }
  0xdf   :  { %v175_v15 = vadd.s32 1, %v1066_v13  ;;  %368 = vmatprep.subr.mxu0 %v315_v0  ;;  %v630_v10 = vld [vmem:[%s1297_s7 + $0x68] sm:$0xff] }
  0xe0   :  { %vm174_vm7 = vc.u32 %v1063_v11, %v1065_v12  ;;  %v173_v29 = vadd.s32 %v1065_v12, %v1063_v11  ;;  %369 = vmatpush1.msra.mxu0 %v314_v1  ;;  %v645_v11 = vld [vmem:[%s1297_s7 + $0xe0] sm:$0xff] }
  0xe1   :  { %v176_v17 = vsel %vm174_vm7, %v175_v15, %v1066_v13  ;;  %779 = vmatprep.subr.mxu0 %v648_v5  ;;  %v629_v12 = vld [vmem:[%s1297_s7 + $0x60] sm:$0xff]  ;;  %v644_v13 = vld [vmem:[%s1297_s7 + $0xd8] sm:$0xff]  ;;  %v643_v15 = vld [vmem:[%s1297_s7 + $0xd0] sm:$0xff] }
  0xe2   :  { %v177_v18 = vadd.s32 %v176_v17, %v172_v16  ;;  %v627_v16 = vld [vmem:[%s1297_s7 + $0x50] sm:$0xff]  ;;  %v642_v17 = vld [vmem:[%s1297_s7 + $0xc8] sm:$0xff] }
  0xe4   :  { %v178_v19 = vadd.s32 536870912, %v177_v18 }
  0xe6   :  { %v179_v20 = vshrl.u32 %v178_v19, 30  ;;  %v641_v19 = vld [vmem:[%s1297_s7 + $0xc0] sm:$0xff] }
  0xe8   :  { %v180_v21 = vshll.u32 %v179_v20, 30  ;;  %v203_v46 = vsub.s32 4, %v179_v20 }
  0xea   :  { %v181_v22 = vsub.s32 %v177_v18, %v180_v21  ;;  %v204_v51 = vsel %vm119_vm9, %v203_v46, %v179_v20  ;;  %v626_v18 = vld [vmem:[%s1297_s7 + $0x48] sm:$0xff]  ;;  %v625_v20 = vld [vmem:[%s1297_s7 + $0x40] sm:$0xff]  ;;  %v640_v21 = vld [vmem:[%s1297_s7 + $0xb8] sm:$0xff] }
  0xeb   :  { %v206_v52 = vsel %vm118_vm10, 0, %v204_v51 }
  0xec   :  { %v183_v23 = vsub.s32 0, %v181_v22  ;;  %v210_v54 = vadd.s32 3, %v206_v52 }
  0xee   :  { %v745_v24 = vmin.u32 %v183_v23, %v181_v22  ;;  %v211_v55 = vand.u32 3, %v210_v54  ;;  %v639_v23 = vld [vmem:[%s1297_s7 + $0xb0] sm:$0xff] }
  0xf0   :  { %v185_v25 = vclz %v745_v24  ;;  %vm216_vm11 = vcmp.eq.s32.totalorder %v211_v55, 2  ;;  %vm213_vm12 = vcmp.eq.s32.totalorder %v211_v55, 0  ;;  %vm212_vm13 = vcmp.lt.s32.totalorder %v211_v55, 2  ;;  %v623_v24 = vld [vmem:[%s1297_s7 + $0x30] sm:$0xff] }
  0xf2   :  { %v746_v26 = vadd.s32 4294967294, %v185_v25  ;;  %v638_v25 = vld [vmem:[%s1297_s7 + $0xa8] sm:$0xff] }
  0xf4   :  { %vm747_vm8 = vcmp.lt.s32.totalorder %v746_v26, 0 }
  0xf5   :  { %v188_v28 = vsel %vm747_vm8, 0, %v746_v26  ;;  %v622_v26 = vld [vmem:[%s1297_s7 + $0x28] sm:$0xff] }
  0xf6   :  { %v189_v30 = vsub.s32 32, %v188_v28  ;;  %v193_v31 = vsub.s32 4294967266, %v188_v28  ;;  %v190_v32 = vshll.u32 %v181_v22, %v188_v28  ;;  %v624_v22 = vld [vmem:[%s1297_s7 + $0x38] sm:$0xff]  ;;  %v637_v28 = vld [vmem:[%s1297_s7 + $0xa0] sm:$0xff] }
  0xf8   :  { %v191_v34 = vshrl.u32 %v173_v29, %v189_v30  ;;  %v194_v35 = vadd.s32 127, %v193_v31  ;;  %v621_v29 = vld [vmem:[%s1297_s7 + $0x20] sm:$0xff]  ;;  %v636_v30 = vld [vmem:[%s1297_s7 + $0x98] sm:$0xff] }
  0xf9   :  { %v620_v31 = vld [vmem:[%s1297_s7 + $0x18] sm:$0xff] }
  0xfa   :  { %v192_v36 = vor.u32 %v191_v34, %v190_v32  ;;  %v195_v37 = vshll.u32 %v194_v35, 23  ;;  %v635_v32 = vld [vmem:[%s1297_s7 + $0x90] sm:$0xff]  ;;  %v634_v35 = vld [vmem:[%s1297_s7 + $0x88] sm:$0xff] }
  0xfb   :  { %v619_v34 = vld [vmem:[%s1297_s7 + $0x10] sm:$0xff] }
  0xfc   :  { %v196_v38 = vor.u32 4788187, %v195_v37  ;;  %v199_v42 = vcvt.s32.f32 %v192_v36  ;;  %v618_v36 = vld [vmem:[%s1297_s7 + $0x8] sm:$0xff]  ;;  %v633_v37 = vld [vmem:[%s1297_s7 + $0x80] sm:$0xff] }
  0xfe   :  { %v197_v40 = vand.u32 2147483647, %v196_v38  ;;  %v617_v38 = vld [vmem:[%s1297_s7] sm:$0xff] }
 0x100   :  { %v200_v43 = vmul.f32 %v199_v42, %v197_v40  ;;  %v324_v40 = vlaneseq }
 0x102   :  { %v201_v45 = vxor.u32 2147483648, %v200_v43  ;;  %v325_v42 = vshrl.u32 %v324_v40, 7 }
 0x104   :  { %v202_v48 = vsel %vm119_vm9, %v201_v45, %v200_v43  ;;  %v326_v43 = vsub.s32 0, %v325_v42  ;;  %v322_v45 = vld [vmem:[%s1296_s6] sm:$0x3]  ;;  %v330_v46 = vsub.s32 1, %v325_v42 }
 0x105   :  { %v205_v49 = vsel %vm118_vm10, %v1045_v27, %v202_v48  ;;  %v748_v27 = vld [vmem:[%s1294_s4] ss:$0 sm:$0xff] }
 0x106   :  { %877 = vcosq.f32 %v205_v49  ;;  %v327_v48 = vrot.slane %v322_v45, %v326_v43 }
 0x107   :  { %879 = vsinq.f32 %v205_v49  ;;  %v331_v49 = vrot.slane %v322_v45, %v330_v46 }
 0x113   :  { %v878_v56 = vpop.eup %877 }
 0x114   :  { %v880_v57 = vpop.eup %879  ;;  %v217_v58 = vxor.u32 2147483648, %v878_v56 }
 0x115   :  { %v214_v59 = vxor.u32 2147483648, %v880_v57 }
 0x116   :  { %v218_v60 = vsel %vm216_vm11, %v217_v58, %v880_v57 }
 0x117   :  { %v215_v61 = vsel %vm213_vm12, %v878_v56, %v214_v59 }
 0x118   :  { %v219_v33 = vsel %vm212_vm13, %v215_v61, %v218_v60 }
 0x119   :  { %v220_v62 = vsel %vm209_vm14, nan, %v219_v33 }
 0x11a   :  { %854 = vmatmul.mubr.f32.vlgmr.msra.gmra.mxu1 %v220_v62 }
 0x1da   :  { %v310_v2 = vpop.f32.mrf.mxu1 }
 0x1db   :  { %v311_v3 = vadd.f32 %v748_v27, %v310_v2 }
 0x1dc   :  { %v855_v4 = vpop.f32.mrf.mxu1 }
 0x1dd   :  { %749 = vmatmul.mubr.msk.f32.vlgmr.msra.gmra.mxu0 %vm334_vm15, %v311_v3 }
 0x1de   :  { %780 = vmatpush3.msra.mxu0 %v632_v6 }
 0x1df   :  { %781 = vmatprep.subr.mxu0 %v647_v7 }
 0x1e0   :  { %782 = vmatpush3.msra.mxu0 %v631_v8 }
 0x1e1   :  { %783 = vmatprep.subr.mxu0 %v646_v9 }
 0x1e2   :  { %784 = vmatpush3.msra.mxu0 %v630_v10 }
 0x1e3   :  { %785 = vmatprep.subr.mxu0 %v645_v11 }
 0x1e4   :  { %786 = vmatpush3.msra.mxu0 %v629_v12 }
 0x1e5   :  { %787 = vmatprep.subr.mxu0 %v644_v13 }
 0x1e6   :  { %788 = vmatpush3.msra.mxu0 %v628_v14 }
 0x1e7   :  { %789 = vmatprep.subr.mxu0 %v643_v15 }
 0x1e8   :  { %790 = vmatpush3.msra.mxu0 %v627_v16 }
 0x1e9   :  { %791 = vmatprep.subr.mxu0 %v642_v17 }
 0x1ea   :  { %792 = vmatpush3.msra.mxu0 %v626_v18 }
 0x1eb   :  { %793 = vmatprep.subr.mxu0 %v641_v19 }
 0x1ec   :  { %794 = vmatpush3.msra.mxu0 %v625_v20 }
 0x1ed   :  { %795 = vmatprep.subr.mxu0 %v640_v21 }
 0x1ee   :  { %796 = vmatpush3.msra.mxu0 %v624_v22 }
 0x1ef   :  { %797 = vmatprep.subr.mxu0 %v639_v23 }
 0x1f0   :  { %798 = vmatpush3.msra.mxu0 %v623_v24 }
 0x1f1   :  { %799 = vmatprep.subr.mxu0 %v638_v25 }
 0x1f2   :  { %800 = vmatpush3.msra.mxu0 %v622_v26 }
 0x1f3   :  { %801 = vmatprep.subr.mxu0 %v637_v28 }
 0x1f4   :  { %802 = vmatpush3.msra.mxu0 %v621_v29 }
 0x1f5   :  { %803 = vmatprep.subr.mxu0 %v636_v30 }
 0x1f6   :  { %804 = vmatpush3.msra.mxu0 %v620_v31 }
 0x1f7   :  { %805 = vmatprep.subr.mxu0 %v635_v32 }
 0x1f8   :  { %806 = vmatpush3.msra.mxu0 %v619_v34 }
 0x1f9   :  { %807 = vmatprep.subr.mxu0 %v634_v35 }
 0x1fa   :  { %808 = vmatpush3.msra.mxu0 %v618_v36 }
 0x1fb   :  { %809 = vmatprep.subr.mxu0 %v633_v37 }
 0x1fc   :  { %810 = vmatpush3.msra.mxu0 %v617_v38 }
 0x29d   :  { %v404_v51 = vpop.f32.mrf.mxu0 }
 0x29e   :  { %v1188_v52 = vadd.f32 %v404_v51, %v327_v48 }
 0x29f   :  { %v406_v54 = vpop.f32.mrf.mxu0 }
 0x2a0   :  { %v409_v55 = vand.u32 2147483647, %v1188_v52  ;;  %v412_v56 = vand.u32 2139095040, %v1188_v52  ;;  %v1192_v57 = vadd.f32 %v406_v54, %v331_v49  ;;  %vm411_vm14 = vcmp.lt.s32.totalorder %v1188_v52, 0 }
 0x2a2   :  { %v413_v58 = vshrl.u32 %v412_v56, 23  ;;  %v416_v59 = vand.u32 8388607, %v409_v55  ;;  %v516_v60 = vand.u32 2139095040, %v1192_v57  ;;  %v513_v33 = vand.u32 2147483647, %v1192_v57 }
 0x2a3   :  { %vm1265_vm15 = vcmp.le.f32.partialorder %v409_v55, 0.7853982 }
 0x2a4   :  { %v750_v61 = vadd.s32 4294967169, %v413_v58  ;;  %v517_v62 = vshrl.u32 %v516_v60, 23  ;;  %v417_v0 = vor.u32 8388608, %v416_v59  ;;  %v520_v27 = vand.u32 8388607, %v513_v33 }
 0x2a6   :  { %v419_v63 = vadd.s32 1, %v750_v61  ;;  %v754_v1 = vadd.s32 4294967169, %v517_v62  ;;  %v1200_v6 = vshll.u32 %v417_v0, 8  ;;  %v521_v9 = vor.u32 8388608, %v520_v27 }
 0x2a8   :  { %vm420_vm0 = vcmp.gt.s32.totalorder %v419_v63, 0  ;;  %v523_v3 = vadd.s32 1, %v754_v1  ;;  %v561_v40 = vshll.u32 %v521_v9, 8 }
 0x2a9   :  { %v421_v2 = vsel %vm420_vm0, %v419_v63, 0  ;;  %vm515_vm0 = vcmp.lt.s32.totalorder %v1192_v57, 0 }
 0x2aa   :  { %v422_v4 = vshrl.u32 %v421_v2, 5  ;;  %v423_v5 = vand.u32 31, %v421_v2  ;;  %vm524_vm1 = vcmp.gt.s32.totalorder %v523_v3, 0 }
 0x2ab   :  { %v525_v23 = vsel %vm524_vm1, %v523_v3, 0  ;;  %vm514_vm1 = vcmp.le.f32.partialorder %v513_v33, 0.7853982 }
 0x2ac   :  { %v424_v7 = vsub.s32 32, %v423_v5  ;;  %v426_v8 = vshll.u32 %v913_v39, %v423_v5  ;;  %v429_v10 = vshll.u32 %v914_v41, %v423_v5  ;;  %v432_v11 = vshll.u32 %v915_v44, %v423_v5 }
 0x2ad   :  { %v435_v12 = vshll.u32 %v916_v47, %v423_v5  ;;  %v438_v13 = vshll.u32 %v917_v50, %v423_v5  ;;  %vm441_vm2 = vcmp.lt.s32.totalorder %v422_v4, 1  ;;  %vm443_vm3 = vcmp.lt.s32.totalorder %v422_v4, 3 }
 0x2ae   :  { %v427_v14 = vshrl.u32 %v914_v41, %v424_v7  ;;  %v430_v15 = vshrl.u32 %v915_v44, %v424_v7  ;;  %v433_v16 = vshrl.u32 %v916_v47, %v424_v7  ;;  %v425_v17 = vshrl.u32 %v913_v39, %v424_v7 }
 0x2af   :  { %v436_v18 = vshrl.u32 %v917_v50, %v424_v7  ;;  %v439_v19 = vshrl.u32 %v918_v53, %v424_v7  ;;  %vm444_vm4 = vcmp.lt.s32.totalorder %v422_v4, 4  ;;  %v527_v26 = vand.u32 31, %v525_v23 }
 0x2b0   :  { %v428_v20 = vor.u32 %v427_v14, %v426_v8  ;;  %v431_v21 = vor.u32 %v430_v15, %v429_v10  ;;  %v434_v22 = vor.u32 %v433_v16, %v432_v11  ;;  %vm442_vm5 = vcmp.lt.s32.totalorder %v422_v4, 2 }
 0x2b1   :  { %v437_v24 = vor.u32 %v436_v18, %v435_v12  ;;  %v440_v25 = vor.u32 %v439_v19, %v438_v13  ;;  %v528_v36 = vsub.s32 32, %v527_v26  ;;  %v526_v46 = vshrl.u32 %v525_v23, 5 }
 0x2b2   :  { %v445_v28 = vsel %vm441_vm2, %v425_v17, %v428_v20  ;;  %v446_v29 = vsel %vm444_vm4, %v434_v22, 2102212464  ;;  %v449_v30 = vsel %vm441_vm2, %v428_v20, %v431_v21  ;;  %v453_v31 = vsel %vm441_vm2, %v431_v21, %v434_v22 }
 0x2b3   :  { %v447_v32 = vsel %vm443_vm3, %v431_v21, %v446_v29  ;;  %v450_v34 = vsel %vm444_vm4, %v437_v24, 920167782  ;;  %v454_v35 = vsel %vm444_vm4, %v440_v25, 1326507024  ;;  %v530_v56 = vshll.u32 %v913_v39, %v527_v26 }
 0x2b4   :  { %v451_v37 = vsel %vm443_vm3, %v434_v22, %v450_v34  ;;  %v455_v38 = vsel %vm443_vm3, %v437_v24, %v454_v35  ;;  %v448_v42 = vsel %vm442_vm5, %v445_v28, %v447_v32  ;;  %v531_v58 = vshrl.u32 %v914_v41, %v528_v36 }
 0x2b5   :  { %v452_v43 = vsel %vm442_vm5, %v449_v30, %v451_v37  ;;  %v456_v45 = vsel %vm442_vm5, %v453_v31, %v455_v38  ;;  %v533_v59 = vshll.u32 %v914_v41, %v527_v26  ;;  %v534_v60 = vshrl.u32 %v915_v44, %v528_v36 }
 0x2b6   :  { %v1221_v48 = vmul.u32.u64.low %v1200_v6, %v456_v45  ;;  %v1222_v49 = vmul.u32.u64.high %v1200_v6, %v456_v45, %v1221_v48  ;;  %v1225_v51 = vmul.u32.u64.low %v1200_v6, %v452_v43  ;;  %v1226_v54 = vmul.u32.u64.high %v1200_v6, %v452_v43, %v1225_v51 }
 0x2b7   :  { %v536_v61 = vshll.u32 %v915_v44, %v527_v26  ;;  %v537_v62 = vshrl.u32 %v916_v47, %v528_v36  ;;  %v539_v63 = vshll.u32 %v916_v47, %v527_v26  ;;  %v540_v0 = vshrl.u32 %v917_v50, %v528_v36 }
 0x2b8   :  { %v532_v1 = vor.u32 %v531_v58, %v530_v56  ;;  %v535_v27 = vor.u32 %v534_v60, %v533_v59  ;;  %v542_v2 = vshll.u32 %v917_v50, %v527_v26  ;;  %v543_v3 = vshrl.u32 %v918_v53, %v528_v36 }
 0x2b9   :  { %v464_v4 = vmul.u32 %v1200_v6, %v448_v42  ;;  %vm466_vm6 = vc.u32 %v1222_v49, %v1225_v51  ;;  %v467_v41 = vadd.s32 1, %v1226_v54  ;;  %v538_v44 = vor.u32 %v537_v62, %v536_v61 }
 0x2ba   :  { %v529_v5 = vshrl.u32 %v913_v39, %v528_v36  ;;  %v541_v7 = vor.u32 %v540_v0, %v539_v63  ;;  %v544_v47 = vor.u32 %v543_v3, %v542_v2  ;;  %vm545_vm7 = vcmp.lt.s32.totalorder %v526_v46, 1 }
 0x2bb   :  { %v468_v8 = vsel %vm466_vm6, %v467_v41, %v1226_v54  ;;  %vm547_vm8 = vcmp.lt.s32.totalorder %v526_v46, 3  ;;  %vm548_vm9 = vcmp.lt.s32.totalorder %v526_v46, 4  ;;  %v553_v50 = vsel %vm545_vm7, %v532_v1, %v535_v27 }
 0x2bc   :  { %v469_v9 = vadd.s32 %v468_v8, %v464_v4  ;;  %v550_v53 = vsel %vm548_vm9, %v538_v44, 2102212464  ;;  %v554_v10 = vsel %vm548_vm9, %v541_v7, 920167782  ;;  %v557_v6 = vsel %vm545_vm7, %v535_v27, %v538_v44 }
 0x2bd   :  { %vm546_vm10 = vcmp.lt.s32.totalorder %v526_v46, 2  ;;  %v549_v11 = vsel %vm545_vm7, %v529_v5, %v532_v1  ;;  %v555_v12 = vsel %vm547_vm8, %v538_v44, %v554_v10  ;;  %v558_v13 = vsel %vm548_vm9, %v544_v47, 1326507024 }
 0x2be   :  { %v470_v14 = vadd.s32 536870912, %v469_v9  ;;  %v551_v15 = vsel %vm547_vm8, %v535_v27, %v550_v53  ;;  %v556_v16 = vsel %vm546_vm10, %v553_v50, %v555_v12  ;;  %v559_v39 = vsel %vm547_vm8, %v541_v7, %v558_v13 }
 0x2bf   :  { %v560_v17 = vsel %vm546_vm10, %v557_v6, %v559_v39  ;;  %v1245_v18 = vmul.u32.u64.low %v561_v40, %v556_v16  ;;  %v1246_v19 = vmul.u32.u64.high %v561_v40, %v556_v16, %v1245_v18  ;;  %v552_v23 = vsel %vm546_vm10, %v549_v11, %v551_v15 }
 0x2c0   :  { %v1248_v20 = vshrl.u32 %v470_v14, 30  ;;  %v1250_v21 = vmul.u32.u64.low %v561_v40, %v560_v17  ;;  %v1251_v22 = vmul.u32.u64.high %v561_v40, %v560_v17, %v1250_v21  ;;  %v568_v28 = vmul.u32 %v561_v40, %v552_v23 }
 0x2c1   :  { %v571_v25 = vadd.s32 1, %v1246_v19  ;;  %v465_v45 = vadd.s32 %v1225_v51, %v1222_v49  ;;  %vm605_vm8 = vweird.f32 %v1192_v57  ;;  %vm501_vm9 = vweird.f32 %v1188_v52 }
 0x2c2   :  { %v472_v24 = vshll.u32 %v1248_v20, 30  ;;  %vm570_vm11 = vc.u32 %v1251_v22, %v1245_v18  ;;  %v569_v4 = vadd.s32 %v1245_v18, %v1251_v22  ;;  %v495_v13 = vsub.s32 4, %v1248_v20 }
 0x2c3   :  { %v572_v29 = vsel %vm570_vm11, %v571_v25, %v1246_v19  ;;  %vm726_vm10 = vcmask 64512  }
 0x2c4   :  { %v473_v26 = vsub.s32 %v469_v9, %v472_v24  ;;  %v573_v31 = vadd.s32 %v572_v29, %v568_v28  ;;  %v496_v39 = vsel %vm411_vm14, %v495_v13, %v1248_v20 }
 0x2c5   :  { %v498_v18 = vsel %vm1265_vm15, 0, %v496_v39 }
 0x2c6   :  { %v475_v30 = vsub.s32 0, %v473_v26  ;;  %v574_v34 = vadd.s32 536870912, %v573_v31  ;;  %v502_v21 = vadd.s32 3, %v498_v18 }
 0x2c8   :  { %v751_v32 = vmin.u32 %v475_v30, %v473_v26  ;;  %v575_v36 = vshrl.u32 %v574_v34, 30  ;;  %v503_v25 = vand.u32 3, %v502_v21 }
 0x2ca   :  { %v477_v35 = vclz %v751_v32  ;;  %v576_v38 = vshll.u32 %v575_v36, 30  ;;  %v599_v15 = vsub.s32 4, %v575_v36  ;;  %vm505_vm2 = vcmp.eq.s32.totalorder %v503_v25, 0 }
 0x2cb   :  { %vm508_vm3 = vcmp.eq.s32.totalorder %v503_v25, 2  ;;  %vm504_vm6 = vcmp.lt.s32.totalorder %v503_v25, 2 }
 0x2cc   :  { %v752_v37 = vadd.s32 4294967294, %v477_v35  ;;  %v577_v42 = vsub.s32 %v573_v31, %v576_v38  ;;  %v600_v17 = vsel %vm515_vm0, %v599_v15, %v575_v36 }
 0x2cd   :  { %v602_v19 = vsel %vm514_vm1, 0, %v600_v17 }
 0x2ce   :  { %vm753_vm12 = vcmp.lt.s32.totalorder %v752_v37, 0  ;;  %v579_v48 = vsub.s32 0, %v577_v42  ;;  %v606_v24 = vadd.s32 3, %v602_v19 }
 0x2cf   :  { %v480_v43 = vsel %vm753_vm12, 0, %v752_v37 }
 0x2d0   :  { %v481_v46 = vsub.s32 32, %v480_v43  ;;  %v485_v40 = vsub.s32 4294967266, %v480_v43  ;;  %v482_v54 = vshll.u32 %v473_v26, %v480_v43  ;;  %v755_v59 = vmin.u32 %v579_v48, %v577_v42 }
 0x2d1   :  { %v607_v28 = vand.u32 3, %v606_v24 }
 0x2d2   :  { %v483_v56 = vshrl.u32 %v465_v45, %v481_v46  ;;  %v486_v58 = vadd.s32 127, %v485_v40  ;;  %v581_v62 = vclz %v755_v59  ;;  %v758_v46 = vld [vmem:[%s1298_s8] ss:$0 sm:$0xff] }
 0x2d3   :  { %vm612_vm4 = vcmp.eq.s32.totalorder %v607_v28, 2  ;;  %vm609_vm5 = vcmp.eq.s32.totalorder %v607_v28, 0  ;;  %vm608_vm7 = vcmp.lt.s32.totalorder %v607_v28, 2 }
 0x2d4   :  { %v484_v60 = vor.u32 %v483_v56, %v482_v54  ;;  %v487_v61 = vshll.u32 %v486_v58, 23  ;;  %v756_v0 = vadd.s32 4294967294, %v581_v62 }
 0x2d6   :  { %v488_v63 = vor.u32 4788187, %v487_v61  ;;  %v491_v27 = vcvt.s32.f32 %v484_v60  ;;  %vm757_vm13 = vcmp.lt.s32.totalorder %v756_v0, 0 }
 0x2d7   :  { %v584_v2 = vsel %vm757_vm13, 0, %v756_v0 }
 0x2d8   :  { %v489_v1 = vand.u32 2147483647, %v488_v63  ;;  %v585_v49 = vsub.s32 32, %v584_v2  ;;  %v589_v51 = vsub.s32 4294967266, %v584_v2  ;;  %v586_v44 = vshll.u32 %v577_v42, %v584_v2 }
 0x2da   :  { %v492_v3 = vmul.f32 %v491_v27, %v489_v1  ;;  %v587_v5 = vshrl.u32 %v569_v4, %v585_v49  ;;  %v590_v7 = vadd.s32 127, %v589_v51 }
 0x2dc   :  { %v493_v41 = vxor.u32 2147483648, %v492_v3  ;;  %v588_v8 = vor.u32 %v587_v5, %v586_v44  ;;  %v591_v50 = vshll.u32 %v590_v7, 23 }
 0x2de   :  { %v494_v47 = vsel %vm411_vm14, %v493_v41, %v492_v3  ;;  %v592_v10 = vor.u32 4788187, %v591_v50  ;;  %v595_v11 = vcvt.s32.f32 %v588_v8 }
 0x2df   :  { %v497_v53 = vsel %vm1265_vm15, %v1188_v52, %v494_v47 }
 0x2e0   :  { %v593_v6 = vand.u32 2147483647, %v592_v10  ;;  %881 = vcosq.f32 %v497_v53 }
 0x2e1   :  { %883 = vsinq.f32 %v497_v53 }
 0x2e2   :  { %v596_v12 = vmul.f32 %v595_v11, %v593_v6 }
 0x2e4   :  { %v597_v14 = vxor.u32 2147483648, %v596_v12 }
 0x2e6   :  { %v598_v55 = vsel %vm515_vm0, %v597_v14, %v596_v12 }
 0x2e7   :  { %v601_v16 = vsel %vm514_vm1, %v1192_v57, %v598_v55 }
 0x2e8   :  { %885 = vcosq.f32 %v601_v16 }
 0x2e9   :  { %887 = vsinq.f32 %v601_v16 }
 0x2ed   :  { %v882_v22 = vpop.eup %881 }
 0x2ee   :  { %v884_v23 = vpop.eup %883  ;;  %v509_v33 = vxor.u32 2147483648, %v882_v22 }
 0x2ef   :  { %v506_v26 = vxor.u32 2147483648, %v884_v23 }
 0x2f0   :  { %v510_v32 = vsel %vm508_vm3, %v509_v33, %v884_v23 }
 0x2f1   :  { %v507_v31 = vsel %vm505_vm2, %v882_v22, %v506_v26 }
 0x2f2   :  { %v511_v37 = vsel %vm504_vm6, %v507_v31, %v510_v32 }
 0x2f3   :  { %v512_v43 = vsel %vm501_vm9, nan, %v511_v37 }
 0x2f5   :  { %v886_v29 = vpop.eup %885 }
 0x2f6   :  { %v888_v30 = vpop.eup %887  ;;  %v613_v20 = vxor.u32 2147483648, %v886_v29 }
 0x2f7   :  { %v610_v34 = vxor.u32 2147483648, %v888_v30 }
 0x2f8   :  { %v614_v35 = vsel %vm612_vm4, %v613_v20, %v888_v30 }
 0x2f9   :  { %v611_v36 = vsel %vm609_vm5, %v886_v29, %v610_v34 }
 0x2fa   :  { %v615_v38 = vsel %vm608_vm7, %v611_v36, %v614_v35 }
 0x2fb   :  { %v616_v42 = vsel %vm605_vm8, nan, %v615_v38 }
 0x2fc   :  { %720 = vmatprep.mubr.f32.mxu0 %v616_v42 }
 0x2fd   :  { %721 = vmatmul.mubr.f32.vlgmr.msra.gmra.mxu0 %v512_v43 }
 0x3bd   :  { %v811_v45 = vpop.f32.mrf.mxu0 }
 0x3bf   :  { %v812_v40 = vpop.f32.mrf.mxu0 }
 0x3c0   :  { %v813_v48 = vadd.f32 %v812_v40, %v811_v45 }
 0x3c2   :  { %v723_v54 = vadd.f32 %v813_v48, %v758_v46 }
 0x3c4   :  { %727 = vst.msk [vmem:[#allocation2] sm:$0xff] %vm726_vm10, %v723_v54 }
 0x3c5   :  { %900 = shalt.err (!%p897_p4)
}
 0x3c6   :  { %737 = dma.vmem_to_hbm [thread:$0]  %s735_s28, 128, %s1299_s9, [#allocation3]  }
 0x3c7   :  { %909 = dma.done.wait [#allocation3], 128  }
 0x3c8   :  { %910 = vsyncadd [#allocation3], 4294967168 }
 0x3c9   :  { %741 = vsyncpa [#allocation3], 1 }

</bundles_post_ra>
